<compile_context>
chip_gen: v6e
topology: v6e:2x2x1
jax: 0.10.0
libtpu: 0.0.40
codegen_flags: <defaults>
</compile_context>

<pallas_src>
import functools

import jax
import jax.numpy as jnp
from jax.experimental import pallas as pl
from jax.experimental.pallas import tpu as pltpu


# ---------------------------------------------------------------------------
# helpers
# ---------------------------------------------------------------------------
def _round_up(v, m):
    return (v + m - 1) // m * m


def _pad2d(a, rows, cols, dtype=jnp.float32):
    out = jnp.zeros((rows, cols), dtype)
    return out.at[: a.shape[0], : a.shape[1]].set(a.astype(dtype))


# ---------------------------------------------------------------------------
# SAGE layer kernel: tiled mean-aggregation + fused linear
# ---------------------------------------------------------------------------
def _sage_layer_kernel(adj_ref, xk_ref, xi_ref, invdeg_ref, wl_ref, wr_ref,
                       b_ref, h_ref, hbf_ref, acc_ref, *, apply_relu):
    k = pl.program_id(1)

    @pl.when(k == 0)
    def _init():
        acc_ref[...] = jnp.zeros_like(acc_ref)

    # bf16 adjacency-counts x bf16 neighbor features, f32 MXU accumulation.
    acc_ref[...] += jnp.dot(adj_ref[...], xk_ref[...],
                            preferred_element_type=jnp.float32)

    @pl.when(k == pl.num_programs(1) - 1)
    def _finalize():
        # mean aggregation: scale accumulated sums by 1/deg (f32, VPU).
        agg = acc_ref[...] * invdeg_ref[...]
        # two K=128 dots (agg @ W_l + x_root @ W_r) instead of a stacked copy.
        h = (jnp.dot(agg, wl_ref[...], preferred_element_type=jnp.float32)
             + jnp.dot(xi_ref[...], wr_ref[...],
                       preferred_element_type=jnp.float32)
             + b_ref[...])
        if apply_relu:
            h = jnp.maximum(h, 0.0)
        h_ref[...] = h
        hbf_ref[...] = h.astype(jnp.bfloat16)   # bf16 copy for the next layer's
        #                                         neighbor stream (no wrapper cast)


def _sage_layer(adj_bf, inv_deg, x_root, x_nb, w_l, w_r, bias, *,
                apply_relu, tile_i, tile_k):
    n_p = adj_bf.shape[0]
    cin_p = x_root.shape[1]
    cout_p = w_l.shape[1]
    grid = (n_p // tile_i, n_p // tile_k)

    # Deeper buffering on the dominant (adjacency) DMA stream only when the
    # K grid is deep enough to benefit; default double-buffering otherwise.
    if grid[1] > 2:
        adj_spec = pl.BlockSpec((tile_i, tile_k), lambda i, k: (i, k),
                                pipeline_mode=pl.Buffered(3))
    else:
        adj_spec = pl.BlockSpec((tile_i, tile_k), lambda i, k: (i, k))

    kernel = functools.partial(_sage_layer_kernel, apply_relu=apply_relu)
    h_f32, h_bf16 = pl.pallas_call(
        kernel,
        out_shape=(jax.ShapeDtypeStruct((n_p, cout_p), jnp.float32),
                   jax.ShapeDtypeStruct((n_p, cout_p), jnp.bfloat16)),
        grid_spec=pltpu.PrefetchScalarGridSpec(
            num_scalar_prefetch=0,
            grid=grid,
            in_specs=[
                adj_spec,                                             # adjacency counts (bf16)
                pl.BlockSpec((tile_k, cin_p), lambda i, k: (k, 0)),   # neighbor features (bf16)
                pl.BlockSpec((tile_i, cin_p), lambda i, k: (i, 0)),   # root features (f32)
                pl.BlockSpec((tile_i, 1), lambda i, k: (i, 0)),       # 1/deg (f32)
                pl.BlockSpec((cin_p, cout_p), lambda i, k: (0, 0)),   # W_l
                pl.BlockSpec((cin_p, cout_p), lambda i, k: (0, 0)),   # W_r
                pl.BlockSpec((1, cout_p), lambda i, k: (0, 0)),       # bias
            ],
            out_specs=[
                pl.BlockSpec((tile_i, cout_p), lambda i, k: (i, 0)),
                pl.BlockSpec((tile_i, cout_p), lambda i, k: (i, 0)),
            ],
            scratch_shapes=[pltpu.VMEM((tile_i, cin_p), jnp.float32)],
        ),
        compiler_params=pltpu.CompilerParams(
            dimension_semantics=("parallel", "arbitrary"),
            vmem_limit_bytes=48 * 1024 * 1024,   # v7x-safe; tiles need < ~30 MiB
        ),
    )(adj_bf, x_nb, x_root, inv_deg, w_l, w_r, bias)
    return h_f32, h_bf16


# ---------------------------------------------------------------------------
# full forward
# ---------------------------------------------------------------------------
def no_cross_vanilla_sage_forward(article1_idx, article2_idx,
                                  vanilla, gnn_x, edge_index, params):
    N, cin = gnn_x.shape
    hidden = params["w1l"].shape[1]
    cout = params["w2l"].shape[1]

    cin_p = _round_up(cin, 128)
    hid_p = _round_up(hidden, 128)
    cout_p = _round_up(cout, 128)

    # Tile selection: long K-tiles for the adjacency stream (perf review).
    # tile_k is a multiple of tile_i so one n_p padding serves both grid axes.
    tile_i = min(1024, _round_up(N, 128))
    tile_k = min(4096, _round_up(N, tile_i))
    n_p = _round_up(N, tile_k)

    src = edge_index[0]
    dst = edge_index[1]

    # Dense adjacency edge-counts scattered directly in bf16 (exact for up to
    # 256 duplicate edges per (dst, src) pair, matching PyG scatter-mean);
    # degree via an O(E) scatter -- no extra O(N^2) wrapper passes.
    adj_bf = jnp.zeros((n_p, n_p), jnp.bfloat16).at[dst, src].add(
        jnp.ones(src.shape, jnp.bfloat16))
    deg = jnp.zeros((n_p, 1), jnp.float32).at[dst].add(1.0)
    inv_deg = jnp.where(deg > 0, 1.0 / jnp.maximum(deg, 1.0), 0.0)

    x0_f32 = _pad2d(gnn_x, n_p, cin_p, jnp.float32)
    x0_bf16 = x0_f32.astype(jnp.bfloat16)

    w1l = _pad2d(params["w1l"], cin_p, hid_p)
    w1r = _pad2d(params["w1r"], cin_p, hid_p)
    b1 = jnp.zeros((1, hid_p), jnp.float32).at[0, :hidden].set(params["b1"])
    w2l = _pad2d(params["w2l"], hid_p, cout_p)
    w2r = _pad2d(params["w2r"], hid_p, cout_p)
    b2 = jnp.zeros((1, cout_p), jnp.float32).at[0, :cout].set(params["b2"])

    # conv1 (+ReLU) and conv2 as two tiled Pallas passes; conv1 also emits its
    # bf16 copy in-kernel for conv2's neighbor stream.
    h1_f32, h1_bf16 = _sage_layer(adj_bf, inv_deg, x0_f32, x0_bf16,
                                  w1l, w1r, b1, apply_relu=True,
                                  tile_i=tile_i, tile_k=tile_k)
    h2_f32, _ = _sage_layer(adj_bf, inv_deg, h1_f32, h1_bf16,
                            w2l, w2r, b2, apply_relu=False,
                            tile_i=tile_i, tile_k=tile_k)
    h2 = h2_f32[:N, :cout]

    # Real gathers + concat in the wrapper.
    va = vanilla[article1_idx]
    vb = vanilla[article2_idx]
    ga = h2[article1_idx]
    gb = h2[article2_idx]
    combined = jnp.concatenate([va, vb, ga, gb], axis=1)          # (P, 4*cin)

    # Tiny GEMV classifier in plain JAX (per perf review: a pallas_call's
    # fixed cost + transpose/padding dominates the actual math for small P).
    logits = combined @ params["w_clf"].reshape(-1, 1) + params["b_clf"]

    loss = None  # labels=None path
    return logits, loss


# ---------------------------------------------------------------------------
# deterministic synthetic init (torch Linear-style uniform)
# ---------------------------------------------------------------------------
def init_params(key, in_channels, out_channels, hidden=16):
    keys = jax.random.split(key, 8)

    def u(k, shape, fan_in):
        bound = 1.0 / jnp.sqrt(jnp.float32(fan_in))
        return jax.random.uniform(k, shape, jnp.float32, -bound, bound)

    d_comb = 2 * in_channels + 2 * out_channels   # == 4*in_channels in module
    return {
        "w1l": u(keys[0], (in_channels, hidden), in_channels),   # conv1 lin_l
        "w1r": u(keys[1], (in_channels, hidden), in_channels),   # conv1 lin_r
        "b1":  u(keys[2], (hidden,), in_channels),
        "w2l": u(keys[3], (hidden, out_channels), hidden),       # conv2 lin_l
        "w2r": u(keys[4], (hidden, out_channels), hidden),       # conv2 lin_r
        "b2":  u(keys[5], (out_channels,), hidden),
        "w_clf": u(keys[6], (d_comb,), d_comb),                  # classifier
        "b_clf": u(keys[7], (1,), d_comb),
    }


if __name__ == "__main__":
    key = jax.random.PRNGKey(0)
    k_x, k_v, k_e, k_a, k_b, k_p = jax.random.split(key, 6)

    N = 24             # number of graph nodes
    in_channels = 8
    out_channels = 8   # module requires 2*in + 2*out == 4*in  =>  out == in
    E = 64             # number of directed edges
    P = 4              # number of (article1, article2) pairs

    gnn_x = jax.random.normal(k_x, (N, in_channels), dtype=jnp.float32)
    vanilla = jax.random.normal(k_v, (N, in_channels), dtype=jnp.float32)
    edge_index = jax.random.randint(k_e, (2, E), 0, N, dtype=jnp.int32)
    article1_idx = jax.random.randint(k_a, (P,), 0, N, dtype=jnp.int32)
    article2_idx = jax.random.randint(k_b, (P,), 0, N, dtype=jnp.int32)

    params = init_params(k_p, in_channels, out_channels)

    logits, loss = no_cross_vanilla_sage_forward(
        article1_idx, article2_idx, vanilla, gnn_x, edge_index, params)
    logits = jax.block_until_ready(logits)
    assert logits.shape == (P, 1)
    assert loss is None
    print("KERNEL_OK")
</pallas_src>

<mosaic_0001>
module attributes {stable_mosaic.version = 11 : i64} {
  func.func @_sage_layer_kernel(%arg0: i32, %arg1: i32, %arg2: memref<128x128xbf16, #tpu.memory_space<vmem>>, %arg3: memref<128x128xbf16, #tpu.memory_space<vmem>>, %arg4: memref<128x128xf32, #tpu.memory_space<vmem>>, %arg5: memref<128x1xf32, #tpu.memory_space<vmem>>, %arg6: memref<128x128xf32, #tpu.memory_space<vmem>>, %arg7: memref<128x128xf32, #tpu.memory_space<vmem>>, %arg8: memref<1x128xf32, #tpu.memory_space<vmem>>, %arg9: memref<128x128xf32, #tpu.memory_space<vmem>>, %arg10: memref<128x128xbf16, #tpu.memory_space<vmem>>, %arg11: memref<128x128xf32, #tpu.memory_space<vmem>>) attributes {dimension_semantics = [#tpu.dimension_semantics<parallel>, #tpu.dimension_semantics<arbitrary>], iteration_bounds = array<i64: 1, 1>, scalar_prefetch = 0 : i64, scratch_operands = 1 : i64, tpu.core_type = #tpu.core_type<tc>, window_params = [{transform_indices = @transform_0, window_bounds = array<i64: 128, 128>}, {transform_indices = @transform_1, window_bounds = array<i64: 128, 128>}, {transform_indices = @transform_2, window_bounds = array<i64: 128, 128>}, {transform_indices = @transform_3, window_bounds = array<i64: 128, 1>}, {pipeline_mode = #tpu.pipeline_mode<synchronous>, transform_indices = @transform_4, window_bounds = array<i64: 128, 128>}, {pipeline_mode = #tpu.pipeline_mode<synchronous>, transform_indices = @transform_5, window_bounds = array<i64: 128, 128>}, {pipeline_mode = #tpu.pipeline_mode<synchronous>, transform_indices = @transform_6, window_bounds = array<i64: 1, 128>}, {transform_indices = @transform_7, window_bounds = array<i64: 128, 128>}, {transform_indices = @transform_8, window_bounds = array<i64: 128, 128>}]} {
    %c0_i32 = arith.constant 0 : i32
    %0 = arith.cmpi eq, %arg1, %c0_i32 : i32
    %1 = arith.extui %0 : i1 to i32
    %c0_i32_0 = arith.constant 0 : i32
    %2 = arith.cmpi ne, %1, %c0_i32_0 : i32
    scf.if %2 {
      %cst_10 = arith.constant 0.000000e+00 : f32
      %12 = vector.broadcast %cst_10 : f32 to vector<128x128xf32>
      %c0_11 = arith.constant 0 : index
      %c0_12 = arith.constant 0 : index
      %13 = vector.load %arg11[%c0_11, %c0_12] : memref<128x128xf32, #tpu.memory_space<vmem>>, vector<128x128xf32>
      tpu.vector_store %arg11[%c0_11, %c0_12], %12 {strides = array<i32>} : memref<128x128xf32, #tpu.memory_space<vmem>>, vector<128x128xf32>,
    } else {
    }
    %c0 = arith.constant 0 : index
    %c0_1 = arith.constant 0 : index
    %3 = vector.load %arg11[%c0, %c0_1] : memref<128x128xf32, #tpu.memory_space<vmem>>, vector<128x128xf32>
    %c0_2 = arith.constant 0 : index
    %c0_3 = arith.constant 0 : index
    %4 = vector.load %arg2[%c0_2, %c0_3] : memref<128x128xbf16, #tpu.memory_space<vmem>>, vector<128x128xbf16>
    %c0_4 = arith.constant 0 : index
    %c0_5 = arith.constant 0 : index
    %5 = vector.load %arg3[%c0_4, %c0_5] : memref<128x128xbf16, #tpu.memory_space<vmem>>, vector<128x128xbf16>
    %cst = arith.constant dense<0.000000e+00> : vector<128x128xf32>
    %6 = tpu.matmul %4, %5, %cst {dimension_numbers = #tpu.dot_dimension_numbers<[1], [0], [0], [1], [0, 0, 1, 1], [], []>} : vector<128x128xbf16>, vector<128x128xbf16>, vector<128x128xf32> -> vector<128x128xf32>
    %7 = arith.addf %3, %6 : vector<128x128xf32>
    %c0_6 = arith.constant 0 : index
    %c0_7 = arith.constant 0 : index
    %8 = vector.load %arg11[%c0_6, %c0_7] : memref<128x128xf32, #tpu.memory_space<vmem>>, vector<128x128xf32>
    tpu.vector_store %arg11[%c0_6, %c0_7], %7 {strides = array<i32>} : memref<128x128xf32, #tpu.memory_space<vmem>>, vector<128x128xf32>,
    %c0_i32_8 = arith.constant 0 : i32
    %9 = arith.cmpi eq, %arg1, %c0_i32_8 : i32
    %10 = arith.extui %9 : i1 to i32
    %c0_i32_9 = arith.constant 0 : i32
    %11 = arith.cmpi ne, %10, %c0_i32_9 : i32
    scf.if %11 {
      %c0_10 = arith.constant 0 : index
      %c0_11 = arith.constant 0 : index
      %12 = vector.load %arg11[%c0_10, %c0_11] : memref<128x128xf32, #tpu.memory_space<vmem>>, vector<128x128xf32>
      %c0_12 = arith.constant 0 : index
      %c0_13 = arith.constant 0 : index
      %13 = vector.load %arg5[%c0_12, %c0_13] : memref<128x1xf32, #tpu.memory_space<vmem>>, vector<128x1xf32>
      %14 = vector.broadcast %13 : vector<128x1xf32> to vector<128x128xf32>
      %15 = arith.mulf %12, %14 : vector<128x128xf32>
      %c0_14 = arith.constant 0 : index
      %c0_15 = arith.constant 0 : index
      %16 = vector.load %arg6[%c0_14, %c0_15] : memref<128x128xf32, #tpu.memory_space<vmem>>, vector<128x128xf32>
      %cst_16 = arith.constant dense<0.000000e+00> : vector<128x128xf32>
      %17 = tpu.matmul %15, %16, %cst_16 {dimension_numbers = #tpu.dot_dimension_numbers<[1], [0], [0], [1], [0, 0, 1, 1], [], []>} : vector<128x128xf32>, vector<128x128xf32>, vector<128x128xf32> -> vector<128x128xf32>
      %c0_17 = arith.constant 0 : index
      %c0_18 = arith.constant 0 : index
      %18 = vector.load %arg4[%c0_17, %c0_18] : memref<128x128xf32, #tpu.memory_space<vmem>>, vector<128x128xf32>
      %c0_19 = arith.constant 0 : index
      %c0_20 = arith.constant 0 : index
      %19 = vector.load %arg7[%c0_19, %c0_20] : memref<128x128xf32, #tpu.memory_space<vmem>>, vector<128x128xf32>
      %cst_21 = arith.constant dense<0.000000e+00> : vector<128x128xf32>
      %20 = tpu.matmul %18, %19, %cst_21 {dimension_numbers = #tpu.dot_dimension_numbers<[1], [0], [0], [1], [0, 0, 1, 1], [], []>} : vector<128x128xf32>, vector<128x128xf32>, vector<128x128xf32> -> vector<128x128xf32>
      %21 = arith.addf %17, %20 : vector<128x128xf32>
      %c0_22 = arith.constant 0 : index
      %c0_23 = arith.constant 0 : index
      %22 = vector.load %arg8[%c0_22, %c0_23] : memref<1x128xf32, #tpu.memory_space<vmem>>, vector<1x128xf32>
      %23 = vector.broadcast %22 : vector<1x128xf32> to vector<128x128xf32>
      %24 = arith.addf %21, %23 : vector<128x128xf32>
      %cst_24 = arith.constant 0.000000e+00 : f32
      %25 = vector.broadcast %cst_24 : f32 to vector<128x128xf32>
      %26 = arith.maximumf %24, %25 : vector<128x128xf32>
      %c0_25 = arith.constant 0 : index
      %c0_26 = arith.constant 0 : index
      %27 = vector.load %arg9[%c0_25, %c0_26] : memref<128x128xf32, #tpu.memory_space<vmem>>, vector<128x128xf32>
      tpu.vector_store %arg9[%c0_25, %c0_26], %26 {strides = array<i32>} : memref<128x128xf32, #tpu.memory_space<vmem>>, vector<128x128xf32>,
      %28 = arith.truncf %26 : vector<128x128xf32> to vector<128x128xbf16>
      %c0_27 = arith.constant 0 : index
      %c0_28 = arith.constant 0 : index
      %29 = vector.load %arg10[%c0_27, %c0_28] : memref<128x128xbf16, #tpu.memory_space<vmem>>, vector<128x128xbf16>
      tpu.vector_store %arg10[%c0_27, %c0_28], %28 {strides = array<i32>} : memref<128x128xbf16, #tpu.memory_space<vmem>>, vector<128x128xbf16>,
    } else {
    }
    return
  }
  func.func @transform_0(%arg0: i32, %arg1: i32) -> (i32, i32) {
    %c0_i32 = arith.constant 0 : i32
    return %arg0, %arg1 : i32, i32
  }
  func.func @transform_1(%arg0: i32, %arg1: i32) -> (i32, i32) {
    %c0_i32 = arith.constant 0 : i32
    %c0_i32_0 = arith.constant 0 : i32
    return %arg1, %c0_i32 : i32, i32
  }
  func.func @transform_2(%arg0: i32, %arg1: i32) -> (i32, i32) {
    %c0_i32 = arith.constant 0 : i32
    %c0_i32_0 = arith.constant 0 : i32
    return %arg0, %c0_i32 : i32, i32
  }
  func.func @transform_3(%arg0: i32, %arg1: i32) -> (i32, i32) {
    %c0_i32 = arith.constant 0 : i32
    %c0_i32_0 = arith.constant 0 : i32
    return %arg0, %c0_i32 : i32, i32
  }
  func.func @transform_4(%arg0: i32, %arg1: i32) -> (i32, i32) {
    %c0_i32 = arith.constant 0 : i32
    %c0_i32_0 = arith.constant 0 : i32
    %c0_i32_1 = arith.constant 0 : i32
    return %c0_i32, %c0_i32_0 : i32, i32
  }
  func.func @transform_5(%arg0: i32, %arg1: i32) -> (i32, i32) {
    %c0_i32 = arith.constant 0 : i32
    %c0_i32_0 = arith.constant 0 : i32
    %c0_i32_1 = arith.constant 0 : i32
    return %c0_i32, %c0_i32_0 : i32, i32
  }
  func.func @transform_6(%arg0: i32, %arg1: i32) -> (i32, i32) {
    %c0_i32 = arith.constant 0 : i32
    %c0_i32_0 = arith.constant 0 : i32
    %c0_i32_1 = arith.constant 0 : i32
    return %c0_i32, %c0_i32_0 : i32, i32
  }
  func.func @transform_7(%arg0: i32, %arg1: i32) -> (i32, i32) {
    %c0_i32 = arith.constant 0 : i32
    %c0_i32_0 = arith.constant 0 : i32
    return %arg0, %c0_i32 : i32, i32
  }
  func.func @transform_8(%arg0: i32, %arg1: i32) -> (i32, i32) {
    %c0_i32 = arith.constant 0 : i32
    %c0_i32_0 = arith.constant 0 : i32
    return %arg0, %c0_i32 : i32, i32
  }
}

</mosaic_0001>

<bundles_post_ra>
// kernel: tpu_custom_call.1
= control target key start
LH: loop header
LB: loop body
LE: loop exit
PB: predicated region body
PF: predicated region fallthrough
CT: control target
= control target key end

     0   :  { %14 = vsyncpa [#allocation4], 0  ;;  %s1777_s0 = inlined_call_operand.hbm [shape: bf16[128,128], index: 0, kind: input, shape index: {}]   ;;  %s1778_s1 = inlined_call_operand.hbm [shape: bf16[128,128], index: 1, kind: input, shape index: {}]   ;;  %s1779_s2 = inlined_call_operand.vmem [shape: f32[128,128], index: 2, kind: input, shape index: {}]   ;;  %s1780_s3 = inlined_call_operand.vmem [shape: f32[128,1], index: 3, kind: input, shape index: {}]   ;;  %s1781_s4 = inlined_call_operand.hbm [shape: f32[128,128], index: 4, kind: input, shape index: {}]   ;;  %s1782_s5 = inlined_call_operand.hbm [shape: f32[128,128], index: 5, kind: input, shape index: {}]   ;;  %s1783_s6 = inlined_call_operand.vmem [shape: f32[1,128], index: 6, kind: input, shape index: {}]   ;;  %s1784_s7 = inlined_call_operand.hbm [shape: f32[128,128], index: 7, kind: output, shape index: {0}]   ;;  %s1785_s8 = inlined_call_operand.hbm [shape: bf16[128,128], index: 8, kind: output, shape index: {1}]  }
   0x1   :  { %15 = vsyncpa [#allocation7], 0 }
   0x2   :  { %16 = vsyncpa [#allocation10], 0 }
   0x3   :  { %17 = vsyncpa [#allocation5], 0 }
   0x4   :  { %18 = vsyncpa [#allocation13], 0  ;;  %s1529_s27 = smov [#allocation6]   ;;  %s1530_s29 = smov [#allocation3]  }
   0x5   :  { %s36_s28 = sshll.u32 %s1529_s27, 4  ;;  %s24_s30 = sshll.u32 %s1530_s29, 4  ;;  %s37_s28 = int_to_ptr.vmem [resolvable:$true] %s36_s28  ;;  %s25_s30 = int_to_ptr.vmem [resolvable:$true] %s24_s30 }
   0x6   :  { %s1407_s9 = scalar_lea.vmem %s37_s28, 1024  ;;  %p1412_p1 = scmp.lt.s32.totalorder %s37_s28, %s37_s28 }
   0x7   :  { %p1408_p0 = scmp.ne.s32.totalorder %s37_s28, %s1407_s9  ;;  %p1413_p2 = scmp.lt.s32.totalorder %s1407_s9, %s1407_s9 }
   0x9   :  { %p1414_p3 = por %p1413_p2, %p1412_p1 }
   0xb   :  { %p1415_p4 = pnand %p1414_p3, %p1408_p0 }
   0xd   :  { %1418 = shalt.err (!%p1415_p4)
}
   0xe   :  { %s1531_s10 = smov 64   ;;  %s1532_s11 = smov 4  }
   0xf   :  { %42 = dma.hbm_to_vmem [thread:$0]  %s1778_s1, 1024, %s37_s28, [#allocation7], %s1531_s10, %s1531_s10, %s1532_s11  }
  0x10   :  { %s1427_s14 = scalar_lea.vmem %s25_s30, 1024  ;;  %p1432_p6 = scmp.lt.s32.totalorder %s25_s30, %s25_s30 }
  0x11   :  { %p1428_p5 = scmp.ne.s32.totalorder %s25_s30, %s1427_s14  ;;  %p1433_p7 = scmp.lt.s32.totalorder %s1427_s14, %s1427_s14 }
  0x13   :  { %p1434_p8 = por %p1433_p7, %p1432_p6 }
  0x15   :  { %p1435_p9 = pnand %p1434_p8, %p1428_p5 }
  0x17   :  { %1438 = shalt.err (!%p1435_p9)
}
  0x18   :  { %30 = dma.hbm_to_vmem [thread:$0]  %s1777_s0, 1024, %s25_s30, [#allocation4], %s1531_s10, %s1531_s10, %s1532_s11  }
  0x19   :  { %s1533_s17 = smov [#allocation8]  }
  0x1a   :  { %s52_s18 = sshll.u32 %s1533_s17, 4  ;;  %s53_s18 = int_to_ptr.vmem [resolvable:$true] %s52_s18 }
  0x1b   :  { %s1447_s19 = scalar_lea.vmem %s53_s18, 2048  ;;  %p1452_p11 = scmp.lt.s32.totalorder %s53_s18, %s53_s18 }
  0x1c   :  { %p1448_p10 = scmp.ne.s32.totalorder %s53_s18, %s1447_s19  ;;  %p1453_p12 = scmp.lt.s32.totalorder %s1447_s19, %s1447_s19 }
  0x1e   :  { %p1454_p13 = por %p1453_p12, %p1452_p11 }
  0x20   :  { %p1455_p0 = pnand %p1454_p13, %p1448_p10 }
  0x22   :  { %1458 = shalt.err (!%p1455_p0)
}
  0x23   :  { %s1534_s1 = smov 128   ;;  %s1535_s20 = smov 8  }
  0x24   :  { %58 = dma.hbm_to_vmem [thread:$0]  %s1781_s4, 2048, %s53_s18, [#allocation7], %s1534_s1, %s1534_s1, %s1535_s20  }
  0x25   :  { %s1536_s0 = smov [#allocation9]  }
  0x26   :  { %s64_s23 = sshll.u32 %s1536_s0, 4  ;;  %s65_s23 = int_to_ptr.vmem [resolvable:$true] %s64_s23 }
  0x27   :  { %s1467_s24 = scalar_lea.vmem %s65_s23, 2048  ;;  %p1472_p2 = scmp.lt.s32.totalorder %s65_s23, %s65_s23 }
  0x28   :  { %p1468_p1 = scmp.ne.s32.totalorder %s65_s23, %s1467_s24  ;;  %p1473_p3 = scmp.lt.s32.totalorder %s1467_s24, %s1467_s24 }
  0x2a   :  { %p1474_p4 = por %p1473_p3, %p1472_p2 }
  0x2c   :  { %p1475_p5 = pnand %p1474_p4, %p1468_p1 }
  0x2e   :  { %1478 = shalt.err (!%p1475_p5)
}
  0x2f   :  { %70 = dma.hbm_to_vmem [thread:$0]  %s1782_s5, 2048, %s65_s23, [#allocation10], %s1534_s1, %s1534_s1, %s1535_s20  }
  0x30   :  { %1519 = dma.done.wait [#allocation4], 1024  }
  0x31   :  { %1520 = vsyncadd [#allocation4], 4294966272 }
  0x32   :  { %1521 = dma.done.wait [#allocation7], 3072  }
  0x33   :  { %1522 = vsyncadd [#allocation7], 4294964224 }
  0x34   :  { %1523 = dma.done.wait [#allocation10], 2048  }
  0x35   :  { %1524 = vsyncadd [#allocation10], 4294965248  ;;  %v1537_v0 = vmov 0   ;;  %v1383_v1 = vld [vmem:[#allocation6 + $0x38] sm:$0xff]   ;;  %v1384_v2 = vld [vmem:[#allocation6 + $0x30] sm:$0xff]   ;;  %s1539_s25 = smov [#allocation12]  }
  0x36   :  { %1382 = vset.pattern.permute.xlu1 %v1537_v0  ;;  %1381 = vset.pattern.permute.xlu0 %v1537_v0  ;;  %v1385_v3 = vld [vmem:[#allocation6 + $0x28] sm:$0xff]   ;;  %v1386_v4 = vld [vmem:[#allocation6 + $0x20] sm:$0xff]   ;;  %v1387_v6 = vld [vmem:[#allocation6 + $0x18] sm:$0xff]   ;;  %s1000_s26 = sshll.u32 %s1539_s25, 4  ;;  %s1001_s26 = int_to_ptr.vmem [resolvable:$true] %s1000_s26 }
  0x37   :  { %1194 = vmatprep.subr.bf16.mxu0 %v1383_v1  ;;  %v1391_v5 = vld [vmem:[#allocation3] sm:$0xff]   ;;  %v1388_v7 = vld [vmem:[#allocation6 + $0x10] sm:$0xff]   ;;  %v399_v8 = vld [vmem:[%s1780_s3 + $0x8] sm:$0xff] }
  0x38   :  { %1195 = vmatpush3.bf16.msra.mxu0 %v1383_v1  ;;  %1210 = vmatprep.mubr.bf16.mxu0 %v1391_v5  ;;  %v398_v9 = vld [vmem:[%s1780_s3] sm:$0xff]  ;;  %v407_v10 = vld [vmem:[%s1780_s3 + $0x48] sm:$0xff]  ;;  %v557_v13 = vld [vmem:[#allocation9 + $0x78] sm:$0xff] }
  0x39   :  { %1196 = vmatprep.subr.bf16.mxu0 %v1384_v2  ;;  %421 = vperm.xlu1 %1382, %v399_v8   ;;  %v406_v11 = vld [vmem:[%s1780_s3 + $0x40] sm:$0xff]  ;;  %v1389_v12 = vld [vmem:[#allocation6 + $0x8] sm:$0xff]   ;;  %v556_v14 = vld [vmem:[#allocation9 + $0x70] sm:$0xff] }
  0x3a   :  { %416 = vperm.xlu0 %1381, %v398_v9   ;;  %v408_v15 = vld [vmem:[%s1780_s3 + $0x50] sm:$0xff]  ;;  %1226 = vmatprep.subr.mxu1 %v557_v13  ;;  %v1390_v17 = vld [vmem:[#allocation6] sm:$0xff]   ;;  %v555_v18 = vld [vmem:[#allocation9 + $0x68] sm:$0xff] }
  0x3b   :  { %v400_v16 = vld [vmem:[%s1780_s3 + $0x10] sm:$0xff]  ;;  %1227 = vmatpush3.msra.mxu1 %v557_v13  ;;  %v409_v19 = vld [vmem:[%s1780_s3 + $0x58] sm:$0xff]  ;;  %v554_v21 = vld [vmem:[#allocation9 + $0x60] sm:$0xff] }
  0x3c   :  { %1197 = vmatpush3.bf16.msra.mxu0 %v1384_v2  ;;  %1228 = vmatprep.subr.mxu1 %v556_v14  ;;  %v401_v20 = vld [vmem:[%s1780_s3 + $0x18] sm:$0xff]  ;;  %v526_v24 = vld [vmem:[%s1779_s2] sm:$0xff]  ;;  %v1392_v25 = vld [vmem:[#allocation3 + $0x8] sm:$0xff]  }
  0x3d   :  { %1198 = vmatprep.subr.bf16.mxu0 %v1385_v3  ;;  %461 = vperm.xlu1 %1382, %v407_v10   ;;  %v553_v22 = vld [vmem:[#allocation9 + $0x58] sm:$0xff]  ;;  %v410_v26 = vld [vmem:[%s1780_s3 + $0x60] sm:$0xff]  ;;  %v1393_v28 = vld [vmem:[#allocation3 + $0x10] sm:$0xff]  }
  0x3e   :  { %456 = vperm.xlu0 %1381, %v406_v11   ;;  %1229 = vmatpush3.msra.mxu1 %v556_v14  ;;  %v1633_v23 = vld [vmem:[#allocation8 + $0x78] sm:$0xff]  ;;  %v402_v27 = vld [vmem:[%s1780_s3 + $0x20] sm:$0xff]  ;;  %v552_v29 = vld [vmem:[#allocation9 + $0x50] sm:$0xff] }
  0x3f   :  { %1230 = vmatprep.subr.mxu1 %v555_v18  ;;  %1258 = vmatprep.mubr.f32.mxu1 %v526_v24  ;;  %v411_v30 = vld [vmem:[%s1780_s3 + $0x68] sm:$0xff]  ;;  %v1651_v33 = vld [vmem:[#allocation8 + $0x70] sm:$0xff]  ;;  %v550_v34 = vld [vmem:[#allocation9 + $0x40] sm:$0xff] }
  0x40   :  { %1199 = vmatpush3.bf16.msra.mxu0 %v1385_v3  ;;  %1231 = vmatpush3.msra.mxu1 %v555_v18  ;;  %v403_v31 = vld [vmem:[%s1780_s3 + $0x28] sm:$0xff]  ;;  %v1394_v36 = vld [vmem:[#allocation3 + $0x18] sm:$0xff]   ;;  %v412_v37 = vld [vmem:[%s1780_s3 + $0x70] sm:$0xff] }
  0x41   :  { %1200 = vmatprep.subr.bf16.mxu0 %v1386_v4  ;;  %466 = vperm.xlu1 %1382, %v408_v15   ;;  %v551_v32 = vld [vmem:[#allocation9 + $0x48] sm:$0xff]  ;;  %v404_v38 = vld [vmem:[%s1780_s3 + $0x30] sm:$0xff]  ;;  %v1395_v39 = vld [vmem:[#allocation3 + $0x20] sm:$0xff]  }
  0x42   :  { %426 = vperm.xlu0 %1381, %v400_v16   ;;  %1232 = vmatprep.subr.mxu1 %v554_v21  ;;  %v1654_v35 = vld [vmem:[#allocation8 + $0x68] sm:$0xff]  ;;  %v549_v40 = vld [vmem:[#allocation9 + $0x38] sm:$0xff]  ;;  %v548_v43 = vld [vmem:[#allocation9 + $0x30] sm:$0xff] }
  0x43   :  { %1233 = vmatpush3.msra.mxu1 %v554_v21  ;;  %v413_v41 = vld [vmem:[%s1780_s3 + $0x78] sm:$0xff]  ;;  %v1671_v44 = vld [vmem:[#allocation8 + $0x60] sm:$0xff]  ;;  %v547_v45 = vld [vmem:[#allocation9 + $0x28] sm:$0xff] }
  0x44   :  { %1201 = vmatpush3.bf16.msra.mxu0 %v1386_v4  ;;  %1234 = vmatprep.subr.mxu1 %v553_v22  ;;  %v405_v42 = vld [vmem:[%s1780_s3 + $0x38] sm:$0xff]  ;;  %v1396_v47 = vld [vmem:[#allocation3 + $0x28] sm:$0xff]   ;;  %v1397_v48 = vld [vmem:[#allocation3 + $0x30] sm:$0xff]  }
  0x45   :  { %1202 = vmatprep.subr.bf16.mxu0 %v1387_v6  ;;  %471 = vperm.xlu1 %1382, %v409_v19   ;;  %v1674_v46 = vld [vmem:[#allocation8 + $0x58] sm:$0xff]  ;;  %v546_v49 = vld [vmem:[#allocation9 + $0x20] sm:$0xff]  ;;  %v520_v51 = vld [vmem:[#allocation8 + $0x50] sm:$0xff] }
  0x46   :  { %431 = vperm.xlu0 %1381, %v401_v20   ;;  %1235 = vmatpush3.msra.mxu1 %v553_v22  ;;  %v545_v50 = vld [vmem:[#allocation9 + $0x18] sm:$0xff]  ;;  %v544_v52 = vld [vmem:[#allocation9 + $0x10] sm:$0xff]  ;;  %v519_v53 = vld [vmem:[#allocation8 + $0x48] sm:$0xff] }
  0x47   :  { %1236 = vmatprep.subr.mxu1 %v552_v29  ;;  %v543_v54 = vld [vmem:[#allocation9 + $0x8] sm:$0xff]  ;;  %v518_v55 = vld [vmem:[#allocation8 + $0x40] sm:$0xff]  ;;  %v1398_v56 = vld [vmem:[#allocation3 + $0x38] sm:$0xff]  }
  0x48   :  { %1203 = vmatpush3.bf16.msra.mxu0 %v1387_v6  ;;  %1237 = vmatpush3.msra.mxu1 %v552_v29  ;;  %v542_v57 = vld [vmem:[#allocation9] sm:$0xff]  ;;  %v517_v58 = vld [vmem:[#allocation8 + $0x38] sm:$0xff]  ;;  %v527_v59 = vld [vmem:[%s1779_s2 + $0x8] sm:$0xff] }
  0x49   :  { %1204 = vmatprep.subr.bf16.mxu0 %v1388_v7  ;;  %476 = vperm.xlu1 %1382, %v410_v26   ;;  %v528_v60 = vld [vmem:[%s1779_s2 + $0x10] sm:$0xff]  ;;  %v529_v62 = vld [vmem:[%s1779_s2 + $0x18] sm:$0xff]  ;;  %v515_v63 = vld [vmem:[#allocation8 + $0x28] sm:$0xff] }
  0x4a   :  { %436 = vperm.xlu0 %1381, %v402_v27   ;;  %1238 = vmatprep.subr.mxu1 %v551_v32  ;;  %v516_v61 = vld [vmem:[#allocation8 + $0x30] sm:$0xff]  ;;  %v530_v0 = vld [vmem:[%s1779_s2 + $0x20] sm:$0xff]  ;;  %v531_v1 = vld [vmem:[%s1779_s2 + $0x28] sm:$0xff] }
  0x4b   :  { %1239 = vmatpush3.msra.mxu1 %v551_v32  ;;  %v514_v2 = vld [vmem:[#allocation8 + $0x20] sm:$0xff]  ;;  %v513_v3 = vld [vmem:[#allocation8 + $0x18] sm:$0xff]  ;;  %v532_v4 = vld [vmem:[%s1779_s2 + $0x30] sm:$0xff] }
  0x4c   :  { %1205 = vmatpush3.bf16.msra.mxu0 %v1388_v7  ;;  %1240 = vmatprep.subr.mxu1 %v550_v34  ;;  %v533_v5 = vld [vmem:[%s1779_s2 + $0x38] sm:$0xff]  ;;  %v512_v6 = vld [vmem:[#allocation8 + $0x10] sm:$0xff]  ;;  %v511_v7 = vld [vmem:[#allocation8 + $0x8] sm:$0xff] }
  0x4d   :  { %1206 = vmatprep.subr.bf16.mxu0 %v1389_v12  ;;  %481 = vperm.xlu1 %1382, %v411_v30   ;;  %v534_v8 = vld [vmem:[%s1779_s2 + $0x40] sm:$0xff]  ;;  %v535_v9 = vld [vmem:[%s1779_s2 + $0x48] sm:$0xff]  ;;  %v536_v11 = vld [vmem:[%s1779_s2 + $0x50] sm:$0xff] }
  0x4e   :  { %441 = vperm.xlu0 %1381, %v403_v31   ;;  %1241 = vmatpush3.msra.mxu1 %v550_v34  ;;  %v510_v10 = vld [vmem:[#allocation8] sm:$0xff]  ;;  %v539_v14 = vld [vmem:[%s1779_s2 + $0x68] sm:$0xff]  ;;  %v540_v15 = vld [vmem:[%s1779_s2 + $0x70] sm:$0xff] }
  0x4f   :  { %1242 = vmatprep.subr.mxu1 %v549_v40  ;;  %v538_v13 = vld [vmem:[%s1779_s2 + $0x60] sm:$0xff]  ;;  %v541_v16 = vld [vmem:[%s1779_s2 + $0x78] sm:$0xff] }
  0x50   :  { %1207 = vmatpush3.bf16.msra.mxu0 %v1389_v12  ;;  %1243 = vmatpush3.msra.mxu1 %v549_v40  ;;  %v537_v12 = vld [vmem:[%s1779_s2 + $0x58] sm:$0xff] }
  0x51   :  { %1208 = vmatprep.subr.bf16.mxu0 %v1390_v17  ;;  %486 = vperm.xlu1 %1382, %v412_v37  }
  0x52   :  { %446 = vperm.xlu0 %1381, %v404_v38   ;;  %1244 = vmatprep.subr.mxu1 %v548_v43 }
  0x53   :  { %1245 = vmatpush3.msra.mxu1 %v548_v43 }
  0x54   :  { %1209 = vmatpush3.bf16.msra.mxu0 %v1390_v17  ;;  %1246 = vmatprep.subr.mxu1 %v547_v45 }
  0x55   :  { %1282 = vmatprep.subr.mxu0 %v1633_v23  ;;  %491 = vperm.xlu1 %1382, %v413_v41  }
  0x56   :  { %451 = vperm.xlu0 %1381, %v405_v42   ;;  %1247 = vmatpush3.msra.mxu1 %v547_v45 }
  0x57   :  { %1211 = vmatmul.mubr.bf16.vlgmr.msra.gmra.mxu0 %v1392_v25  ;;  %1248 = vmatprep.subr.mxu1 %v546_v49 }
  0x58   :  { %1214 = vmatprep.mubr.bf16.mxu0 %v1393_v28  ;;  %1283 = vmatpush3.msra.mxu0 %v1633_v23 }
  0x59   :  { %1284 = vmatprep.subr.mxu0 %v1651_v33  ;;  %1249 = vmatpush3.msra.mxu1 %v546_v49 }
  0x5a   :  { %1285 = vmatpush3.msra.mxu0 %v1651_v33  ;;  %1250 = vmatprep.subr.mxu1 %v545_v50 }
  0x5b   :  { %1286 = vmatprep.subr.mxu0 %v1654_v35  ;;  %1251 = vmatpush3.msra.mxu1 %v545_v50 }
  0x5c   :  { %1287 = vmatpush3.msra.mxu0 %v1654_v35  ;;  %1252 = vmatprep.subr.mxu1 %v544_v52 }
  0x5d   :  { %1288 = vmatprep.subr.mxu0 %v1671_v44  ;;  %1253 = vmatpush3.msra.mxu1 %v544_v52 }
  0x5e   :  { %1289 = vmatpush3.msra.mxu0 %v1671_v44  ;;  %1254 = vmatprep.subr.mxu1 %v543_v54 }
  0x5f   :  { %1215 = vmatmul.mubr.bf16.gmra.mxu0 %v1394_v36  ;;  %1290 = vmatprep.subr.mxu0 %v1674_v46 }
  0x60   :  { %1218 = vmatprep.mubr.bf16.mxu0 %v1395_v39  ;;  %1291 = vmatpush3.msra.mxu0 %v1674_v46 }
  0x61   :  { %1292 = vmatprep.subr.mxu0 %v520_v51  ;;  %1255 = vmatpush3.msra.mxu1 %v543_v54 }
  0x62   :  { %1293 = vmatpush3.msra.mxu0 %v520_v51  ;;  %1256 = vmatprep.subr.mxu1 %v542_v57 }
  0x63   :  { %1294 = vmatprep.subr.mxu0 %v519_v53  ;;  %1257 = vmatpush3.msra.mxu1 %v542_v57 }
  0x64   :  { %1295 = vmatpush3.msra.mxu0 %v519_v53  ;;  %1259 = vmatmul.mubr.f32.vlgmr.msra.gmra.mxu1 %v527_v59 }
  0x65   :  { %1296 = vmatprep.subr.mxu0 %v518_v55  ;;  %1338 = vmatprep.subr.mxu1 %v1633_v23 }
  0x66   :  { %1297 = vmatpush3.msra.mxu0 %v518_v55  ;;  %1354 = vmatpush3.msra.mxu1 %v1633_v23 }
  0x67   :  { %1219 = vmatmul.mubr.bf16.gmra.mxu0 %v1396_v47  ;;  %1298 = vmatprep.subr.mxu0 %v517_v58 }
  0x68   :  { %1222 = vmatprep.mubr.bf16.mxu0 %v1397_v48  ;;  %1261 = vmatprep.mubr.f32.mxu1 %v528_v60 }
  0x69   :  { %1339 = vmatprep.subr.mxu1 %v1651_v33  ;;  %1299 = vmatpush3.msra.mxu0 %v517_v58 }
  0x6a   :  { %1355 = vmatpush3.msra.mxu1 %v1651_v33  ;;  %1300 = vmatprep.subr.mxu0 %v516_v61 }
  0x6b   :  { %1262 = vmatmul.mubr.f32.gmra.mxu1 %v529_v62  ;;  %1340 = vmatprep.subr.mxu1 %v1654_v35 }
  0x6c   :  { %1301 = vmatpush3.msra.mxu0 %v516_v61  ;;  %1356 = vmatpush3.msra.mxu1 %v1654_v35 }
  0x6d   :  { %1302 = vmatprep.subr.mxu0 %v515_v63  ;;  %1264 = vmatprep.mubr.f32.mxu1 %v530_v0 }
  0x6e   :  { %1341 = vmatprep.subr.mxu1 %v1671_v44  ;;  %1303 = vmatpush3.msra.mxu0 %v515_v63 }
  0x6f   :  { %1223 = vmatmul.mubr.bf16.gmra.mxu0 %v1398_v56  ;;  %1265 = vmatmul.mubr.f32.gmra.mxu1 %v531_v1 }
  0x70   :  { %1304 = vmatprep.subr.mxu0 %v514_v2  ;;  %1357 = vmatpush3.msra.mxu1 %v1671_v44 }
  0x71   :  { %1305 = vmatpush3.msra.mxu0 %v514_v2  ;;  %1342 = vmatprep.subr.mxu1 %v1674_v46 }
  0x72   :  { %1358 = vmatpush3.msra.mxu1 %v1674_v46  ;;  %1306 = vmatprep.subr.mxu0 %v513_v3 }
  0x73   :  { %1343 = vmatprep.subr.mxu1 %v520_v51  ;;  %1267 = vmatprep.mubr.f32.mxu1 %v532_v4 }
  0x74   :  { %1359 = vmatpush3.msra.mxu1 %v520_v51  ;;  %1307 = vmatpush3.msra.mxu0 %v513_v3 }
  0x75   :  { %1344 = vmatprep.subr.mxu1 %v519_v53  ;;  %1268 = vmatmul.mubr.f32.gmra.mxu1 %v533_v5 }
  0x76   :  { %1360 = vmatpush3.msra.mxu1 %v519_v53  ;;  %1308 = vmatprep.subr.mxu0 %v512_v6 }
  0x77   :  { %1345 = vmatprep.subr.mxu1 %v518_v55  ;;  %1309 = vmatpush3.msra.mxu0 %v512_v6 }
  0x78   :  { %1361 = vmatpush3.msra.mxu1 %v518_v55  ;;  %1310 = vmatprep.subr.mxu0 %v511_v7 }
  0x79   :  { %1346 = vmatprep.subr.mxu1 %v517_v58  ;;  %1270 = vmatprep.mubr.f32.mxu1 %v534_v8 }
  0x7a   :  { %1362 = vmatpush3.msra.mxu1 %v517_v58  ;;  %1311 = vmatpush3.msra.mxu0 %v511_v7 }
  0x7b   :  { %1347 = vmatprep.subr.mxu1 %v516_v61  ;;  %1271 = vmatmul.mubr.f32.gmra.mxu1 %v535_v9 }
  0x7c   :  { %1363 = vmatpush3.msra.mxu1 %v516_v61  ;;  %1312 = vmatprep.subr.mxu0 %v510_v10 }
  0x7d   :  { %1348 = vmatprep.subr.mxu1 %v515_v63  ;;  %1313 = vmatpush3.msra.mxu0 %v510_v10 }
  0x7e   :  { %1364 = vmatpush3.msra.mxu1 %v515_v63  ;;  %1273 = vmatprep.mubr.f32.mxu1 %v536_v11 }
  0x7f   :  { %1349 = vmatprep.subr.mxu1 %v514_v2  ;;  %1274 = vmatmul.mubr.f32.gmra.mxu1 %v537_v12 }
  0x80   :  { %1365 = vmatpush3.msra.mxu1 %v514_v2  ;;  %1276 = vmatprep.mubr.f32.mxu1 %v538_v13 }
  0x81   :  { %1350 = vmatprep.subr.mxu1 %v513_v3 }
  0x82   :  { %1366 = vmatpush3.msra.mxu1 %v513_v3 }
  0x83   :  { %1351 = vmatprep.subr.mxu1 %v512_v6  ;;  %1277 = vmatmul.mubr.f32.gmra.mxu1 %v539_v14  ;;  %v1740_v14 = vld [vmem:[%s1783_s6] ss:$0 sm:$0xff]  ;;  %s1538_s6 = smov [#allocation11]  }
  0x84   :  { %1367 = vmatpush3.msra.mxu1 %v512_v6  ;;  %1279 = vmatprep.mubr.f32.mxu1 %v540_v15  ;;  %s988_s24 = sshll.u32 %s1538_s6, 4  ;;  %s989_s24 = int_to_ptr.vmem [resolvable:$true] %s988_s24 }
  0x85   :  { %1352 = vmatprep.subr.mxu1 %v511_v7  ;;  %s1479_s4 = scalar_lea.vmem %s989_s24, 2048  ;;  %p1484_p7 = scmp.lt.s32.totalorder %s989_s24, %s989_s24 }
  0x86   :  { %1368 = vmatpush3.msra.mxu1 %v511_v7  ;;  %p1480_p6 = scmp.ne.s32.totalorder %s989_s24, %s1479_s4  ;;  %p1485_p8 = scmp.lt.s32.totalorder %s1479_s4, %s1479_s4 }
  0x87   :  { %1353 = vmatprep.subr.mxu1 %v510_v10  ;;  %1280 = vmatmul.mubr.f32.gmra.mxu1 %v541_v16 }
  0x88   :  { %1369 = vmatpush3.msra.mxu1 %v510_v10  ;;  %p1486_p9 = por %p1485_p8, %p1484_p7 }
  0x8a   :  { %p1487_p10 = pnand %p1486_p9, %p1480_p6 }
  0xb4   :  { %v422_v20 = vpop.permute.xlu1 %421 }
  0xb5   :  { %v417_v17 = vpop.permute.xlu0 %416 }
  0xb8   :  { %v462_v22 = vpop.permute.xlu1 %461 }
  0xb9   :  { %v457_v18 = vpop.permute.xlu0 %456 }
  0xbc   :  { %v467_v27 = vpop.permute.xlu1 %466 }
  0xbd   :  { %v427_v19 = vpop.permute.xlu0 %426 }
  0xc0   :  { %v472_v34 = vpop.permute.xlu1 %471 }
  0xc1   :  { %v432_v21 = vpop.permute.xlu0 %431 }
  0xc4   :  { %v477_v42 = vpop.permute.xlu1 %476 }
  0xc5   :  { %v437_v23 = vpop.permute.xlu0 %436 }
  0xc8   :  { %v482_v50 = vpop.permute.xlu1 %481 }
  0xc9   :  { %v442_v29 = vpop.permute.xlu0 %441 }
  0xcc   :  { %v487_v58 = vpop.permute.xlu1 %486 }
  0xcd   :  { %v447_v38 = vpop.permute.xlu0 %446 }
  0xd0   :  { %v492_v63 = vpop.permute.xlu1 %491 }
  0xd1   :  { %v452_v45 = vpop.permute.xlu0 %451 }
 0x117   :  { %v1212_v24 = vpop.f32.mrf.mxu0 }
 0x118   :  { %v496_v32 = vmul.f32 %v1212_v24, %v427_v19 }
 0x119   :  { %v284_v25 = vpop.f32.mrf.mxu0 }
 0x11a   :  { %v494_v26 = vmul.f32 %v417_v17, %v284_v25 }
 0x11b   :  { %v1213_v28 = vpop.f32.mrf.mxu0 }
 0x11c   :  { %1314 = vmatprep.mubr.f32.mxu0 %v494_v26  ;;  %v497_v36 = vmul.f32 %v1213_v28, %v432_v21 }
 0x11d   :  { %v287_v30 = vpop.f32.mrf.mxu0 }
 0x11e   :  { %v495_v31 = vmul.f32 %v422_v20, %v287_v30 }
 0x11f   :  { %v1216_v33 = vpop.f32.mrf.mxu0 }
 0x120   :  { %1315 = vmatmul.mubr.f32.vlgmr.msra.gmra.mxu0 %v495_v31  ;;  %v500_v43 = vmul.f32 %v1216_v33, %v447_v38 }
 0x121   :  { %v300_v35 = vpop.f32.mrf.mxu0  ;;  %1317 = vmatprep.mubr.f32.mxu0 %v496_v32 }
 0x122   :  { %v498_v37 = vmul.f32 %v437_v23, %v300_v35 }
 0x123   :  { %v1217_v39 = vpop.f32.mrf.mxu0 }
 0x124   :  { %1318 = vmatmul.mubr.f32.gmra.mxu0 %v497_v36  ;;  %v501_v47 = vmul.f32 %v1217_v39, %v452_v45  ;;  %v1260_v1 = vpop.f32.mrf.mxu1 }
 0x125   :  { %v303_v40 = vpop.f32.mrf.mxu0  ;;  %1320 = vmatprep.mubr.f32.mxu0 %v498_v37 }
 0x126   :  { %v499_v41 = vmul.f32 %v442_v29, %v303_v40  ;;  %v624_v2 = vpop.f32.mrf.mxu1 }
 0x127   :  { %v1220_v44 = vpop.f32.mrf.mxu0 }
 0x128   :  { %1321 = vmatmul.mubr.f32.gmra.mxu0 %v499_v41  ;;  %v504_v53 = vmul.f32 %v1220_v44, %v467_v27 }
 0x129   :  { %v316_v46 = vpop.f32.mrf.mxu0  ;;  %1323 = vmatprep.mubr.f32.mxu0 %v500_v43 }
 0x12a   :  { %v502_v48 = vmul.f32 %v457_v18, %v316_v46 }
 0x12b   :  { %v1221_v49 = vpop.f32.mrf.mxu0  ;;  %v1263_v3 = vpop.f32.mrf.mxu1 }
 0x12c   :  { %1324 = vmatmul.mubr.f32.gmra.mxu0 %v501_v47  ;;  %1326 = vmatprep.mubr.f32.mxu1 %v502_v48  ;;  %v505_v56 = vmul.f32 %v1221_v49, %v472_v34 }
 0x12d   :  { %v319_v51 = vpop.f32.mrf.mxu0  ;;  %v634_v4 = vpop.f32.mrf.mxu1 }
 0x12e   :  { %v503_v52 = vmul.f32 %v462_v22, %v319_v51 }
 0x12f   :  { %v1224_v54 = vpop.f32.mrf.mxu0  ;;  %v1266_v5 = vpop.f32.mrf.mxu1 }
 0x130   :  { %1327 = vmatmul.mubr.f32.vlgmr.msra.gmra.mxu1 %v503_v52  ;;  %v508_v62 = vmul.f32 %v1224_v54, %v487_v58 }
 0x131   :  { %v332_v55 = vpop.f32.mrf.mxu0  ;;  %1329 = vmatprep.mubr.f32.mxu1 %v504_v53  ;;  %v644_v6 = vpop.f32.mrf.mxu1 }
 0x132   :  { %v506_v57 = vmul.f32 %v477_v42, %v332_v55 }
 0x133   :  { %v1225_v59 = vpop.f32.mrf.mxu0 }
 0x134   :  { %1330 = vmatmul.mubr.f32.gmra.mxu1 %v505_v56  ;;  %v509_v0 = vmul.f32 %v1225_v59, %v492_v63 }
 0x135   :  { %v335_v60 = vpop.f32.mrf.mxu0  ;;  %1332 = vmatprep.mubr.f32.mxu1 %v506_v57  ;;  %v1269_v7 = vpop.f32.mrf.mxu1 }
 0x136   :  { %v507_v61 = vmul.f32 %v482_v50, %v335_v60 }
 0x137   :  { %v654_v8 = vpop.f32.mrf.mxu1 }
 0x138   :  { %1333 = vmatmul.mubr.f32.gmra.mxu1 %v507_v61 }
 0x139   :  { %1335 = vmatprep.mubr.f32.mxu1 %v508_v62 }
 0x13b   :  { %v1272_v9 = vpop.f32.mrf.mxu1 }
 0x13c   :  { %1336 = vmatmul.mubr.f32.gmra.mxu1 %v509_v0 }
 0x13d   :  { %v664_v10 = vpop.f32.mrf.mxu1 }
 0x13f   :  { %v1275_v11 = vpop.f32.mrf.mxu1 }
 0x141   :  { %v1735_v12 = vpop.f32.mrf.mxu1 }
 0x143   :  { %v1742_v17 = vpop.f32.mrf.mxu1 }
 0x145   :  { %v1746_v25 = vpop.f32.mrf.mxu1 }
 0x147   :  { %v1281_v34 = vpop.f32.mrf.mxu1 }
 0x149   :  { %v694_v44 = vpop.f32.mrf.mxu1 }
 0x1e0   :  { %v1316_v13 = vpop.f32.mrf.mxu0 }
 0x1e1   :  { %v775_v15 = vadd.f32 %v1316_v13, %v1260_v1 }
 0x1e2   :  { %v769_v16 = vpop.f32.mrf.mxu0 }
 0x1e3   :  { %v856_v18 = vadd.f32 %v1740_v14, %v775_v15  ;;  %v770_v19 = vadd.f32 %v769_v16, %v624_v2 }
 0x1e4   :  { %v1319_v20 = vpop.f32.mrf.mxu0 }
 0x1e5   :  { %v872_v21 = vmax.f32 %v856_v18, 0.0  ;;  %v855_v22 = vadd.f32 %v1740_v14, %v770_v19  ;;  %v785_v23 = vadd.f32 %v1319_v20, %v1263_v3 }
 0x1e6   :  { %v779_v24 = vpop.f32.mrf.mxu0 }
 0x1e7   :  { %888 = vst [vmem:[#allocation11 + $0x8] sm:$0xff] %v872_v21  ;;  %v871_v26 = vmax.f32 %v855_v22, 0.0  ;;  %v858_v27 = vadd.f32 %v1740_v14, %v785_v23  ;;  %v780_v28 = vadd.f32 %v779_v24, %v634_v4 }
 0x1e8   :  { %v1322_v29 = vpop.f32.mrf.mxu0 }
 0x1e9   :  { %887 = vst [vmem:[#allocation11] sm:$0xff] %v871_v26  ;;  %v1070_v30 = vpack.c.bf16 %v872_v21, %v871_v26  ;;  %v874_v31 = vmax.f32 %v858_v27, 0.0  ;;  %v857_v32 = vadd.f32 %v1740_v14, %v780_v28  ;;  %v795_v33 = vadd.f32 %v1322_v29, %v1266_v5 }
 0x1ea   :  { %v789_v35 = vpop.f32.mrf.mxu0 }
 0x1eb   :  { %1071 = vst [vmem:[#allocation12] sm:$0xff] %v1070_v30   ;;  %890 = vst [vmem:[#allocation11 + $0x18] sm:$0xff] %v874_v31  ;;  %v873_v36 = vmax.f32 %v857_v32, 0.0  ;;  %v860_v37 = vadd.f32 %v1740_v14, %v795_v33  ;;  %v790_v38 = vadd.f32 %v789_v35, %v644_v6 }
 0x1ec   :  { %v1325_v39 = vpop.f32.mrf.mxu0 }
 0x1ed   :  { %889 = vst [vmem:[#allocation11 + $0x10] sm:$0xff] %v873_v36  ;;  %v1075_v40 = vpack.c.bf16 %v874_v31, %v873_v36  ;;  %v876_v41 = vmax.f32 %v860_v37, 0.0  ;;  %v859_v42 = vadd.f32 %v1740_v14, %v790_v38  ;;  %v805_v43 = vadd.f32 %v1325_v39, %v1269_v7 }
 0x1ee   :  { %v799_v45 = vpop.f32.mrf.mxu0 }
 0x1ef   :  { %1107 = vst [vmem:[#allocation12 + $0x8] sm:$0xff] %v1075_v40   ;;  %892 = vst [vmem:[#allocation11 + $0x28] sm:$0xff] %v876_v41  ;;  %v875_v46 = vmax.f32 %v859_v42, 0.0  ;;  %v862_v47 = vadd.f32 %v1740_v14, %v805_v43  ;;  %v800_v48 = vadd.f32 %v799_v45, %v654_v8 }
 0x1f0   :  { %v1328_v49 = vpop.f32.mrf.mxu1 }
 0x1f1   :  { %891 = vst [vmem:[#allocation11 + $0x20] sm:$0xff] %v875_v46  ;;  %v1080_v50 = vpack.c.bf16 %v876_v41, %v875_v46  ;;  %v878_v51 = vmax.f32 %v862_v47, 0.0  ;;  %v861_v52 = vadd.f32 %v1740_v14, %v800_v48  ;;  %v815_v53 = vadd.f32 %v1328_v49, %v1272_v9 }
 0x1f2   :  { %v809_v54 = vpop.f32.mrf.mxu1 }
 0x1f3   :  { %1108 = vst [vmem:[#allocation12 + $0x10] sm:$0xff] %v1080_v50   ;;  %894 = vst [vmem:[#allocation11 + $0x38] sm:$0xff] %v878_v51  ;;  %v877_v55 = vmax.f32 %v861_v52, 0.0  ;;  %v864_v56 = vadd.f32 %v1740_v14, %v815_v53  ;;  %v810_v57 = vadd.f32 %v809_v54, %v664_v10 }
 0x1f4   :  { %v1331_v58 = vpop.f32.mrf.mxu1 }
 0x1f5   :  { %893 = vst [vmem:[#allocation11 + $0x30] sm:$0xff] %v877_v55  ;;  %v1085_v59 = vpack.c.bf16 %v878_v51, %v877_v55  ;;  %v880_v60 = vmax.f32 %v864_v56, 0.0  ;;  %v863_v61 = vadd.f32 %v1740_v14, %v810_v57  ;;  %v825_v62 = vadd.f32 %v1331_v58, %v1275_v11 }
 0x1f6   :  { %v819_v63 = vpop.f32.mrf.mxu1 }
 0x1f7   :  { %1109 = vst [vmem:[#allocation12 + $0x18] sm:$0xff] %v1085_v59   ;;  %896 = vst [vmem:[#allocation11 + $0x48] sm:$0xff] %v880_v60  ;;  %v879_v0 = vmax.f32 %v863_v61, 0.0  ;;  %v866_v1 = vadd.f32 %v1740_v14, %v825_v62  ;;  %v820_v2 = vadd.f32 %v819_v63, %v1735_v12 }
 0x1f8   :  { %v1334_v3 = vpop.f32.mrf.mxu1 }
 0x1f9   :  { %895 = vst [vmem:[#allocation11 + $0x40] sm:$0xff] %v879_v0  ;;  %v1090_v4 = vpack.c.bf16 %v880_v60, %v879_v0  ;;  %v882_v5 = vmax.f32 %v866_v1, 0.0  ;;  %v865_v6 = vadd.f32 %v1740_v14, %v820_v2  ;;  %v835_v7 = vadd.f32 %v1334_v3, %v1742_v17 }
 0x1fa   :  { %v829_v8 = vpop.f32.mrf.mxu1 }
 0x1fb   :  { %1110 = vst [vmem:[#allocation12 + $0x20] sm:$0xff] %v1090_v4   ;;  %898 = vst [vmem:[#allocation11 + $0x58] sm:$0xff] %v882_v5  ;;  %v881_v9 = vmax.f32 %v865_v6, 0.0  ;;  %v868_v10 = vadd.f32 %v1740_v14, %v835_v7  ;;  %v830_v11 = vadd.f32 %v829_v8, %v1746_v25 }
 0x1fc   :  { %v1337_v13 = vpop.f32.mrf.mxu1 }
 0x1fd   :  { %897 = vst [vmem:[#allocation11 + $0x50] sm:$0xff] %v881_v9  ;;  %v1095_v15 = vpack.c.bf16 %v882_v5, %v881_v9  ;;  %v884_v12 = vmax.f32 %v868_v10, 0.0  ;;  %v867_v16 = vadd.f32 %v1740_v14, %v830_v11  ;;  %v845_v18 = vadd.f32 %v1337_v13, %v1281_v34 }
 0x1fe   :  { %v839_v19 = vpop.f32.mrf.mxu1 }
 0x1ff   :  { %1111 = vst [vmem:[#allocation12 + $0x28] sm:$0xff] %v1095_v15   ;;  %900 = vst [vmem:[#allocation11 + $0x68] sm:$0xff] %v884_v12  ;;  %v883_v20 = vmax.f32 %v867_v16, 0.0  ;;  %v870_v17 = vadd.f32 %v1740_v14, %v845_v18  ;;  %v840_v21 = vadd.f32 %v839_v19, %v694_v44 }
 0x201   :  { %899 = vst [vmem:[#allocation11 + $0x60] sm:$0xff] %v883_v20  ;;  %v1100_v22 = vpack.c.bf16 %v884_v12, %v883_v20  ;;  %v886_v23 = vmax.f32 %v870_v17, 0.0  ;;  %v869_v24 = vadd.f32 %v1740_v14, %v840_v21 }
 0x203   :  { %1112 = vst [vmem:[#allocation12 + $0x30] sm:$0xff] %v1100_v22   ;;  %902 = vst [vmem:[#allocation11 + $0x78] sm:$0xff] %v886_v23  ;;  %v885_v25 = vmax.f32 %v869_v24, 0.0 }
 0x205   :  { %901 = vst [vmem:[#allocation11 + $0x70] sm:$0xff] %v885_v25  ;;  %v1105_v26 = vpack.c.bf16 %v886_v23, %v885_v25 }
 0x206   :  { %1490 = shalt.err (!%p1487_p10)
}
 0x207   :  { %994 = dma.vmem_to_hbm [thread:$0]  %s989_s24, 2048, %s1784_s7, [#allocation5], %s1534_s1, %s1534_s1, %s1535_s20   ;;  %1113 = vst [vmem:[#allocation12 + $0x38] sm:$0xff] %v1105_v26  }
 0x208   :  { %s1499_s28 = scalar_lea.vmem %s1001_s26, 1024  ;;  %p1504_p12 = scmp.lt.s32.totalorder %s1001_s26, %s1001_s26 }
 0x209   :  { %p1500_p11 = scmp.ne.s32.totalorder %s1001_s26, %s1499_s28  ;;  %p1505_p13 = scmp.lt.s32.totalorder %s1499_s28, %s1499_s28 }
 0x20b   :  { %p1506_p0 = por %p1505_p13, %p1504_p12 }
 0x20d   :  { %p1507_p1 = pnand %p1506_p0, %p1500_p11 }
 0x20f   :  { %1510 = shalt.err (!%p1507_p1)
}
 0x210   :  { %1006 = dma.vmem_to_hbm [thread:$0]  %s1001_s26, 1024, %s1785_s8, [#allocation13], %s1531_s10, %s1531_s10, %s1532_s11  }
 0x211   :  { %1525 = dma.done.wait [#allocation5], 2048  }
 0x212   :  { %1526 = vsyncadd [#allocation5], 4294965248 }
 0x213   :  { %1527 = dma.done.wait [#allocation13], 1024  }
 0x214   :  { %1528 = vsyncadd [#allocation13], 4294966272 }
 0x215   :  { %1013 = vsyncpa [#allocation4], 1 }
 0x216   :  { %1014 = vsyncpa [#allocation7], 1 }
 0x217   :  { %1015 = vsyncpa [#allocation10], 1 }
 0x218   :  { %1016 = vsyncpa [#allocation5], 1 }
 0x219   :  { %1017 = vsyncpa [#allocation13], 1 }

</bundles_post_ra>
